<compile_context>
chip_gen: v7x
topology: tpu7x:2x2x1
jax: 0.10.0
libtpu: 0.0.40
codegen_flags: <defaults>
</compile_context>

<pallas_src>
import math

import jax
import jax.numpy as jnp
from jax.experimental import pallas as pl
from jax.experimental.pallas import tpu as pltpu


def _fused_encoder_kernel(x_ref, w_ref, pos_ref, o_ref):
    # x_ref:   (rows_tile, P*K)   packed input rows (K = N_obj*3)
    # w_ref:   (P*K, P*E)         block-diagonal fused weight (grid-invariant)
    # pos_ref: (pos_rows, P*E)    fused bias + positional rows (grid-invariant, small)
    # o_ref:   (rows_tile, P*E)   packed output rows (lane width multiple of 128)
    pos = pos_ref[...]
    pos_rows = pos_ref.shape[0]
    reps = o_ref.shape[0] // pos_rows          # static, small (<= ~16)
    for u in range(reps):
        idx = pl.ds(u * pos_rows, pos_rows)    # static start, multiple of 8
        y = jnp.dot(x_ref[idx, :], w_ref[...], preferred_element_type=jnp.float32)
        o_ref[idx, :] = (y + pos).astype(o_ref.dtype)


def _divisors(n):
    ds, i = set(), 1
    while i * i <= n:
        if n % i == 0:
            ds.add(i)
            ds.add(n // i)
        i += 1
    return sorted(ds)


def _default_rows_target():
    try:
        kind = jax.devices()[0].device_kind.lower()
    except Exception:
        return 4096
    if "v7" in kind:
        return 8192            # 3.2 TB/s HBM per TC: bigger steps hide per-step overhead
    if "v5e" in kind or "v5 lite" in kind or "v5litepod" in kind:
        return 2048            # 16 MiB default scoped VMEM on v5e
    return 4096


def _vmem_limit_bytes():
    cap = 128 << 20
    try:
        cap = int(getattr(pltpu.get_tpu_info(), "vmem_capacity_bytes", cap))
    except Exception:
        pass
    # 64 MiB on 128-MiB-VMEM chips (v5e/v6e), ~48 MiB on v7x (64 MiB physical).
    return int(min(64 << 20, cap * 3 // 4))


def single_encoder_forward(all_polys, w1, b1, w2, b2, pos_emb, *,
                           rows_target=None, out_dtype=jnp.float32):
    """all_polys: (Bs, T, N_obj, 3) float32.  Returns (Bs, T, n_emb) in out_dtype."""
    Bs, T, N_obj, three = all_polys.shape
    assert three == 3
    E = w1.shape[1]
    assert pos_emb.shape == (T, E), "forward requires T == n_t"
    assert w2.shape == (N_obj * E, E)
    K = N_obj * 3

    # ----------------- plain-JAX glue: exact algebraic fusion (tiny) -----------------
    w2r = w2.reshape(N_obj, E, E)
    # W_eff[n*3+k, e] = sum_f W1[k, f] * W2[n, f, e]
    w_eff = jnp.einsum("kf,nfe->nke", w1, w2r).reshape(K, E).astype(jnp.float32)
    pos_eff = (pos_emb + b2[None, :] + (b1 @ w2r.sum(axis=0))[None, :]).astype(jnp.float32)

    # -------------- lane packing: P time-steps per row, P*E % 128 == 0 ---------------
    P = 128 // math.gcd(E, 128)
    if P > 8:
        # Pathological E (e.g. odd): keep block-diagonal MXU redundancy bounded
        # (v5e f32 matmul); accept masked stores instead of a huge weight block.
        P = 1
    T_pad = ((T + P - 1) // P) * P
    if T_pad != T:                 # rare fallback: pad time axis so it packs evenly
        all_polys = jnp.pad(all_polys, ((0, 0), (0, T_pad - T), (0, 0), (0, 0)))
        pos_eff = jnp.pad(pos_eff, ((0, T_pad - T), (0, 0)))
    period = T_pad // P            # pos pattern period, in packed rows

    x_packed = all_polys.reshape(Bs * period, P * K)          # (R, P*K) — metadata reshape
    pos_packed = pos_eff.reshape(period, P * E)               # (period, P*E)
    eye_p = jnp.eye(P, dtype=jnp.float32)
    w_block = jnp.einsum("pq,ke->pkqe", eye_p, w_eff).reshape(P * K, P * E)

    R = Bs * period
    itemsize = jnp.dtype(out_dtype).itemsize
    sublane = max(8, 32 // max(itemsize, 1))                  # 8 for f32, 16 for bf16
    unit = math.lcm(sublane, period)                          # row-tile granularity

    sliced_rows = 0
    if R % unit:                   # degenerate small/odd shapes only (copy is cheap there)
        pad_rows = unit - R % unit
        x_packed = jnp.pad(x_packed, ((0, pad_rows), (0, 0)))
        sliced_rows = pad_rows
        R += pad_rows
    R_units = R // unit

    # --------------------------------- row tiling ------------------------------------
    if rows_target is None:
        rows_target = _default_rows_target()
    vmem_limit = _vmem_limit_bytes()
    lanes_in = ((P * K + 127) // 128) * 128                   # x tile lane-pads in VMEM
    bytes_per_row = 2 * (lanes_in * 4 + P * E * max(itemsize, 4))   # double-buffered in+out
    cap_units = max(1, (vmem_limit // 2) // (bytes_per_row * unit))
    tgt_units = max(1, min(rows_target // unit, cap_units))

    best_d, best_key = 1, None
    for d in _divisors(R_units):
        if d > cap_units and d != 1:
            continue
        grid_len_d = R_units // d
        key = abs(d * unit - rows_target)
        if grid_len_d == 1 and R_units > 1:
            key += rows_target // 4        # mild preference for >=2 grid steps (megacore)
        if best_key is None or key < best_key:
            best_d, best_key = d, key

    if best_d * unit * 4 >= min(rows_target, R):
        # Exact-division grid: no padding, no masking anywhere.
        units_per_tile = best_d
        grid_len = R_units // units_per_tile
    else:
        # Ragged grid: Pallas masks the last partial block; still no wrapper pad/slice.
        units_per_tile = max(1, min(tgt_units, R_units))
        grid_len = -(-R_units // units_per_tile)
    rows_tile = units_per_tile * unit

    # pos buffer: fixed small height (multiple of `unit`, divides rows_tile).
    pos_cap_units = max(1, 512 // unit)
    pos_units = 1
    for d in _divisors(units_per_tile):
        if d <= pos_cap_units and d > pos_units:
            pos_units = d
    pos_rows = pos_units * unit
    pos_tile = jnp.tile(pos_packed, (pos_rows // period, 1))  # (pos_rows, P*E), small

    flops = 2 * R * (P * K) * (P * E)
    bytes_accessed = int(x_packed.size) * 4 + R * P * E * itemsize \
        + int(w_block.size) * 4 + int(pos_tile.size) * 4

    out_packed = pl.pallas_call(
        _fused_encoder_kernel,
        out_shape=jax.ShapeDtypeStruct((R, P * E), out_dtype),
        grid_spec=pltpu.PrefetchScalarGridSpec(
            num_scalar_prefetch=0,
            grid=(grid_len,),
            in_specs=[
                pl.BlockSpec((rows_tile, P * K), lambda i: (i, 0)),
                pl.BlockSpec((P * K, P * E), lambda i: (0, 0)),      # grid-invariant weight
                pl.BlockSpec((pos_rows, P * E), lambda i: (0, 0)),   # grid-invariant pos/bias
            ],
            out_specs=pl.BlockSpec((rows_tile, P * E), lambda i: (i, 0)),
        ),
        compiler_params=pltpu.CompilerParams(
            dimension_semantics=("parallel",),
            vmem_limit_bytes=vmem_limit),
        cost_estimate=pl.CostEstimate(
            flops=flops, transcendentals=0, bytes_accessed=bytes_accessed),
    )(x_packed, w_block, pos_tile)

    if sliced_rows:
        out_packed = out_packed[:R - sliced_rows]
    out = out_packed.reshape(Bs, T_pad, E)
    if T_pad != T:
        out = out[:, :T]
    return out


def _uniform(key, shape, bound):
    return jax.random.uniform(key, shape, jnp.float32, minval=-bound, maxval=bound)


if __name__ == "__main__":
    # Small config consistent with the module (forward requires T == n_t).
    Bs, n_t, n_obj, n_emb = 4, 32, 4, 32
    T = n_t

    key = jax.random.PRNGKey(0)
    k_x, k_w1, k_b1, k_w2, k_b2, k_pos = jax.random.split(key, 6)

    # deterministic parameter init (PyTorch-default-style uniform bounds)
    w1 = _uniform(k_w1, (3, n_emb), 1.0 / math.sqrt(3.0))                            # Linear(3, E), stored (in, out)
    b1 = _uniform(k_b1, (n_emb,), 1.0 / math.sqrt(3.0))
    w2 = _uniform(k_w2, (n_obj * n_emb, n_emb), 1.0 / math.sqrt(n_obj * n_emb))      # Linear(N_obj*E, E)
    b2 = _uniform(k_b2, (n_emb,), 1.0 / math.sqrt(n_obj * n_emb))
    pos_emb = jax.random.normal(k_pos, (n_t, n_emb), jnp.float32)                    # nn.Embedding(n_t, E).weight

    # synthetic `all_polys` (what preprocess() would have produced)
    all_polys = jax.random.normal(k_x, (Bs, T, n_obj, 3), jnp.float32)

    out = single_encoder_forward(all_polys, w1, b1, w2, b2, pos_emb)
    out = jax.block_until_ready(out)

    # pure-JAX reference (un-fused, mirrors the PyTorch module)
    h = jnp.einsum("btnk,ke->btne", all_polys, w1) + b1           # (Bs, T, N_obj, E)
    x = h.reshape(Bs, T, n_obj * n_emb)
    ref = jnp.einsum("btf,fe->bte", x, w2) + b2 + pos_emb[None]   # (Bs, T, E)

    assert out.shape == (Bs, T, n_emb)
    assert out.dtype == jnp.float32
    assert jnp.allclose(out, ref, atol=2e-4, rtol=1e-4), "mismatch vs reference"
    print("KERNEL_OK")
</pallas_src>

<mosaic_0001>
module attributes {stable_mosaic.version = 11 : i64} {
  func.func @_fused_encoder_kernel(%arg0: i32, %arg1: memref<16x48xf32, #tpu.memory_space<vmem>>, %arg2: memref<48x128xf32, #tpu.memory_space<vmem>>, %arg3: memref<16x128xf32, #tpu.memory_space<vmem>>, %arg4: memref<16x128xf32, #tpu.memory_space<vmem>>) attributes {dimension_semantics = [#tpu.dimension_semantics<parallel>], iteration_bounds = array<i64: 2>, scalar_prefetch = 0 : i64, scratch_operands = 0 : i64, tpu.core_type = #tpu.core_type<tc>, window_params = [{transform_indices = @transform_0, window_bounds = array<i64: 16, 48>}, {pipeline_mode = #tpu.pipeline_mode<synchronous>, transform_indices = @transform_1, window_bounds = array<i64: 48, 128>}, {pipeline_mode = #tpu.pipeline_mode<synchronous>, transform_indices = @transform_2, window_bounds = array<i64: 16, 128>}, {transform_indices = @transform_3, window_bounds = array<i64: 16, 128>}]} {
    %c0 = arith.constant 0 : index
    %c0_0 = arith.constant 0 : index
    %0 = vector.load %arg3[%c0, %c0_0] : memref<16x128xf32, #tpu.memory_space<vmem>>, vector<16x128xf32>
    %c0_1 = arith.constant 0 : index
    %c0_2 = arith.constant 0 : index
    %1 = vector.load %arg1[%c0_1, %c0_2] : memref<16x48xf32, #tpu.memory_space<vmem>>, vector<16x48xf32>
    %c0_3 = arith.constant 0 : index
    %c0_4 = arith.constant 0 : index
    %2 = vector.load %arg2[%c0_3, %c0_4] : memref<48x128xf32, #tpu.memory_space<vmem>>, vector<48x128xf32>
    %cst = arith.constant dense<0.000000e+00> : vector<16x128xf32>
    %3 = tpu.matmul %1, %2, %cst {dimension_numbers = #tpu.dot_dimension_numbers<[1], [0], [0], [1], [0, 0, 1, 1], [], []>} : vector<16x48xf32>, vector<48x128xf32>, vector<16x128xf32> -> vector<16x128xf32>
    %4 = arith.addf %3, %0 : vector<16x128xf32>
    %c0_5 = arith.constant 0 : index
    %c0_6 = arith.constant 0 : index
    %5 = vector.load %arg4[%c0_5, %c0_6] : memref<16x128xf32, #tpu.memory_space<vmem>>, vector<16x128xf32>
    tpu.vector_store %arg4[%c0_5, %c0_6], %4 {strides = array<i32>} : memref<16x128xf32, #tpu.memory_space<vmem>>, vector<16x128xf32>,
    return
  }
  func.func @transform_0(%arg0: i32) -> (i32, i32) {
    %c0_i32 = arith.constant 0 : i32
    %c0_i32_0 = arith.constant 0 : i32
    return %arg0, %c0_i32 : i32, i32
  }
  func.func @transform_1(%arg0: i32) -> (i32, i32) {
    %c0_i32 = arith.constant 0 : i32
    %c0_i32_0 = arith.constant 0 : i32
    %c0_i32_1 = arith.constant 0 : i32
    return %c0_i32, %c0_i32_0 : i32, i32
  }
  func.func @transform_2(%arg0: i32) -> (i32, i32) {
    %c0_i32 = arith.constant 0 : i32
    %c0_i32_0 = arith.constant 0 : i32
    %c0_i32_1 = arith.constant 0 : i32
    return %c0_i32, %c0_i32_0 : i32, i32
  }
  func.func @transform_3(%arg0: i32) -> (i32, i32) {
    %c0_i32 = arith.constant 0 : i32
    %c0_i32_0 = arith.constant 0 : i32
    return %arg0, %c0_i32 : i32, i32
  }
}

</mosaic_0001>

<bundles_post_ra>
// kernel: tpu_custom_call.1
= control target key start
LH: loop header
LB: loop body
LE: loop exit
PB: predicated region body
PF: predicated region fallthrough
CT: control target
= control target key end

     0   :  { %8 = vsyncpa [#allocation3], 0  ;;  %s979_s0 = inlined_call_operand.hbm [shape: f32[32,48], index: 0, kind: input, shape index: {}]   ;;  %s980_s1 = inlined_call_operand.hbm [shape: f32[48,128], index: 1, kind: input, shape index: {}]   ;;  %s981_s2 = inlined_call_operand.hbm [shape: f32[16,128], index: 2, kind: input, shape index: {}]   ;;  %s982_s3 = inlined_call_operand.hbm [shape: f32[32,128], index: 3, kind: output, shape index: {}]  }
   0x1   :  { %10 = vsyncpa [#allocation3 + $0x1], 0 }
   0x2   :  { %11 = vsyncpa [#allocation6], 0 }
   0x3   :  { %12 = vsyncpa [#allocation4], 0 }
   0x4   :  { %14 = vsyncpa [#allocation4 + $0x1], 0  ;;  %s734_s12 = smov 0   ;;  %s736_s13 = smov 0  }
   0x5   :  { %s738_s14 = smov 0   ;;  %s740_s15 = smov 0  }
   0x6 LB: > { %s755_s16 = sadd.s32 4294967295, %s704_s15   ;;  %s420_s17 = sadd.s32 4294967294, %s704_s15   ;;  %s704_s15 = sphi %s740_s15, %s1002_s15   ;;  %s700_s14 = sphi %s738_s14, %s1001_s14   ;;  %s696_s13 = sphi %s736_s13, %s1000_s13   ;;  %s692_s12 = sphi %s734_s12, %s999_s12  }
   0x7   : > { %p40_p0 = scmp.ne.s32.totalorder %s696_s13, %s692_s12  ;;  %p983_p1 = scmp.eq.s32.totalorder %s755_s16, 0 }
   0x8   : > { %p112_p3 = scmp.eq.s32.totalorder %s420_s17, 1  ;;  %p421_p5 = scmp.ge.s32.totalorder %s704_s15, 1 }
   0x9   : > { %p764_p4 = por %p983_p1, %p40_p0  ;;  %p119_p7 = scmp.lt.s32.totalorder %s704_s15, 3 }
   0xa   : > { %p769_p6 = por %p112_p3, %p40_p0  ;;  %s706_s21 = smov [#allocation5]  }
   0xb   : > { %s986_s18 = scalar_select %p764_p4, 1, 0 }
   0xc   : > { %s987_s19 = scalar_select %p769_p6, 1, 0 }
   0xd   : > { %p774_p8 = pnand %p421_p5, %p119_p7  ;;  %s131_s22 = sshll.u32 %s706_s21, 4  ;;  %s778_s22 = int_to_ptr.vmem [resolvable:$true] %s131_s22 }
   0xe   : > { %s707_s24 = smov [#allocation7]   ;;  %s548_s28 = scalar_lea.hbm %s980_s1, 768 }
   0xf   : > { %p489_p9 = pneg %p774_p8  ;;  %s144_s25 = sshll.u32 %s707_s24, 4  ;;  %s789_s25 = int_to_ptr.vmem [resolvable:$true] %s144_s25 }
  0x10   : > { %p549_p12 = scmp.ne.s32.totalorder %s980_s1, %s548_s28  ;;  %p555_p5 = scmp.lt.u32.totalorder %s548_s28, %s980_s1 }
  0x11   : > { %p785_p11 = pnand %p489_p9, %p983_p1 }
  0x13   : > { %p550_p13 = pneg %p785_p11 }
  0x15   : > { %p551_p0 = pnand %p550_p13, %p549_p12 }
  0x17   : > { %p552_p3 = pneg %p551_p0 }
  0x19   : > { %p557_p7 = pnand %p555_p5, %p552_p3 }
  0x1b   : > { %560 = shalt.err (!%p557_p7)
}
  0x1c   : > { %s561_s6 = scalar_lea.vmem %s778_s22, 768  ;;  %p569_p2 = scmp.lt.s32.totalorder %s778_s22, %s778_s22 }
  0x1d   : > { %p562_p9 = scmp.ne.s32.totalorder %s778_s22, %s561_s6  ;;  %p570_p12 = scmp.lt.s32.totalorder %s561_s6, %s561_s6 }
  0x1f   : > { %p564_p10 = pnand %p562_p9, %p550_p13  ;;  %p571_p0 = por %p570_p12, %p569_p2 }
  0x21   : > { %p565_p1 = pneg %p564_p10 }
  0x23   : > { %p572_p6 = pnand %p571_p0, %p565_p1 }
  0x25   : > { %575 = shalt.err (!%p572_p6)
}
  0x26   : > { %s708_s7 = smov 128   ;;  %s709_s8 = smov 8  }
  0x27   : > { %492 = dma.hbm_to_vmem [thread:$0]  (!%p785_p11), %s980_s1, 768, %s778_s22, [#allocation6], %s708_s7, %s708_s7, %s709_s8  }
  0x28   : > { %s576_s21 = scalar_lea.hbm %s981_s2, 256 }
  0x29   : > { %p577_p1 = scmp.ne.s32.totalorder %s981_s2, %s576_s21  ;;  %p583_p10 = scmp.lt.u32.totalorder %s576_s21, %s981_s2 }
  0x2b   : > { %p579_p2 = pnand %p577_p1, %p550_p13 }
  0x2d   : > { %p580_p6 = pneg %p579_p2 }
  0x2f   : > { %p585_p3 = pnand %p583_p10, %p580_p6 }
  0x31   : > { %588 = shalt.err (!%p585_p3)
}
  0x32   : > { %s589_s22 = scalar_lea.vmem %s789_s25, 256  ;;  %p597_p12 = scmp.lt.s32.totalorder %s789_s25, %s789_s25 }
  0x33   : > { %p590_p5 = scmp.ne.s32.totalorder %s789_s25, %s589_s22  ;;  %p598_p0 = scmp.lt.s32.totalorder %s589_s22, %s589_s22 }
  0x35   : > { %p592_p7 = pnand %p590_p5, %p550_p13  ;;  %p599_p1 = por %p598_p0, %p597_p12 }
  0x37   : > { %p593_p9 = pneg %p592_p7 }
  0x39   : > { %p600_p2 = pnand %p599_p1, %p593_p9 }
  0x3b   : > { %603 = shalt.err (!%p600_p2)
}
  0x3c   : > { %495 = dma.hbm_to_vmem [thread:$0]  (!%p785_p11), %s981_s2, 256, %s789_s25, [#allocation6], %s708_s7, %s708_s7, %s709_s8  }
  0x3d   : > { %s850_s23 = sadd.s32 1, %s704_s15   ;;  %s27_s4 = sadd.s32 1, %s700_s14 }
  0x3e   : > { %s24_s5 = ssub.s32 %s704_s15, %s850_s23  ;;  %p34_p13 = scmp.ne.s32.totalorder %s700_s14, %s696_s13 }
  0x3f   : > { %p25_p6 = scmp.eq.s32.totalorder %s24_s5, 0  ;;  %p35_p10 = scmp.eq.s32.totalorder %s704_s15, 0 }
  0x40   : > { %p990_p3 = scmp.eq.s32.totalorder %s755_s16, 1  ;;  %p506_p7 = scmp.lt.s32.totalorder %s704_s15, 2 }
  0x41   : > { %s866_s9 = scalar_select %p25_p6, %s700_s14, %s27_s4  }
  0x42   : > { %p860_p5 = por %p990_p3, %p34_p13  ;;  %p36_p9 = por %p35_p10, %p34_p13 }
  0x43   : > { %s158_s10 = sand.u32 1, %s700_s14   ;;  %s440_s25 = sshll.u32 %s704_s15, 8 }
  0x44   : > { %s991_s6 = scalar_select %p860_p5, 1, 0 }
  0x45   : > { %s425_s11 = sshll.u32 %s158_s10, 4  ;;  %s873_s24 = scalar_lea.hbm %s979_s0, %s440_s25 }
  0x46   : > { %s162_s26 = scalar_lea.vmem [#allocation2], %s425_s11  ;;  %p877_p11 = pnand %p506_p7, %p36_p9 }
  0x47   : > { %s169_s27 = sshll.u32 %s162_s26, 4  ;;  %s881_s22 = scalar_lea.sflag [#allocation3], %s158_s10  ;;  %s875_s27 = int_to_ptr.vmem [resolvable:$true] %s169_s27 }
  0x48   : > { %s604_s29 = scalar_lea.hbm %s873_s24, 256  ;;  %p606_p0 = pneg %p877_p11 }
  0x49   : > { %p605_p12 = scmp.ne.s32.totalorder %s873_s24, %s604_s29  ;;  %s609_s5 = scalar_lea.hbm %s979_s0, 512 }
  0x4a   : > { %p610_p13 = scmp.lt.u32.totalorder %s873_s24, %s979_s0  ;;  %p611_p6 = scmp.lt.u32.totalorder %s609_s5, %s604_s29 }
  0x4b   : > { %p607_p1 = pnand %p606_p0, %p605_p12  ;;  %p613_p3 = scmp.lt.u32.totalorder %s604_s29, %s873_s24 }
  0x4c   : > { %p612_p10 = por %p611_p6, %p610_p13 }
  0x4d   : > { %p608_p2 = pneg %p607_p1 }
  0x4e   : > { %p614_p7 = por %p613_p3, %p612_p10 }
  0x50   : > { %p615_p9 = pnand %p614_p7, %p608_p2 }
  0x52   : > { %618 = shalt.err (!%p615_p9)
}
  0x53   : > { %s619_s10 = scalar_lea.vmem %s875_s27, 256  ;;  %s710_s17 = smov [#allocation2]  }
  0x54   : > { %p620_p12 = scmp.ne.s32.totalorder %s875_s27, %s619_s10  ;;  %s624_s21 = sshll.u32 %s710_s17, 4  ;;  %s625_s21 = int_to_ptr.vmem [resolvable:$false] %s624_s21 }
  0x55   : > { %s626_s26 = scalar_lea.vmem %s625_s21, 512  ;;  %p627_p4 = scmp.lt.s32.totalorder %s875_s27, %s625_s21 }
  0x56   : > { %p622_p1 = pnand %p620_p12, %p606_p0  ;;  %p628_p13 = scmp.lt.s32.totalorder %s626_s26, %s619_s10 }
  0x58   : > { %p623_p5 = pneg %p622_p1  ;;  %p629_p6 = por %p628_p13, %p627_p4 }
  0x5a   : > { %p630_p10 = pnand %p629_p6, %p623_p5 }
  0x5c   : > { %633 = shalt.err (!%p630_p10)
}
  0x5d   : > { %499 = dma.hbm_to_vmem [thread:$0]  (!%p877_p11), %s873_s24, 256, %s875_s27, %s881_s22, %s708_s7, %s708_s7, %s709_s8  }
  0x5e   : > { %181 = sbr.rel (%p774_p8) target bundleno = 350 (0x15e), region = 32  ;;  %s915_s29 = sand.u32 (!%p774_p8), 1, %s696_s13  }
  0x5f   : > { %s429_s30 = sshll.u32 (!%p774_p8), %s915_s29, 4  ;;  %s184_s4 = scalar_lea.sflag (!%p774_p8), [#allocation3], %s915_s29 }
  0x60   : > { %s187_s5 = scalar_lea.vmem (!%p774_p8), [#allocation2], %s429_s30  ;;  %p993_p4 = scmp.ne.s32.totalorder (!%p774_p8), %s986_s18, 0 }
  0x65   : > { %679 = dma.done.wait (%p993_p4), %s184_s4, 256  }
  0x66   : > { %681 = vsyncadd (%p993_p4), %s184_s4, 4294967040  ;;  %p994_p5 = scmp.eq.s32.totalorder %s755_s16, 0 }
  0x68   : > { %683 = dma.done.wait (%p994_p5), [#allocation6], 1024   ;;  %p995_p11 = pmov %p994_p5 }
  0x69   : > { %v224_v0 = vld [vmem:[#allocation5] sm:$0xff]  ;;  %v225_v1 = vld [vmem:[#allocation5 + $0x8] sm:$0xff]  ;;  %v226_v2 = vld [vmem:[#allocation5 + $0x10] sm:$0xff]  ;;  %vm230_vm0 = vcmask 392192   ;;  %s217_s18 = scalar_lea.vmem [#allocation8], %s429_s30  ;;  %s441_s7 = sshll.u32 %s755_s16, 8 }
  0x6a   : > { %685 = vsyncadd (%p995_p11), [#allocation6], 4294966272  ;;  %v465_v3 = vpack.c.bf16 %v225_v1, %v224_v0  ;;  %v227_v4 = vld [vmem:[#allocation5 + $0x18] sm:$0xff]  ;;  %v228_v6 = vld [vmem:[#allocation5 + $0x20] sm:$0xff]  ;;  %s328_s20 = sshll.u32 %s217_s18, 4  ;;  %s935_s27 = scalar_lea.hbm %s982_s3, %s441_s7  ;;  %s930_s20 = int_to_ptr.vmem [resolvable:$true] %s328_s20 }
  0x6b   : > { %v469_v5 = vpack.c.bf16 %v227_v4, %v226_v2  ;;  %v229_v7 = vld [vmem:[#allocation5 + $0x28] sm:$0xff]  ;;  %v222_v8 = vld [vmem:[%s187_s5] sm:$0xff]  ;;  %v221_v11 = vld [vmem:[#allocation7 + $0x8] sm:$0xff]  ;;  %s315_s28 = scalar_lea.sflag [#allocation4], %s915_s29  ;;  %s634_s22 = scalar_lea.vmem %s930_s20, 256 }
  0x6c   : > { %466 = vmatprep.subr.bf16.mxu0 %v465_v3  ;;  %462 = vmatprep.mubr.msk.f32.mxu0 %vm230_vm0, %v222_v8  ;;  %v473_v9 = vpack.c.bf16 %v229_v7, %v228_v6  ;;  %v223_v10 = vld [vmem:[%s187_s5 + $0x8] sm:$0xff]  ;;  %v220_v12 = vld [vmem:[#allocation7] sm:$0xff]  ;;  %p635_p8 = scmp.ne.s32.totalorder %s930_s20, %s634_s22  ;;  %p996_p0 = scmp.ne.s32.totalorder %s991_s6, 0 }
  0x6d   : > { %468 = vmatpush3.bf16.msra.mxu0 %v465_v3  ;;  %s711_s16 = smov [#allocation8]  }
  0x6e   : > { %470 = vmatprep.subr.bf16.mxu0 %v469_v5  ;;  %p636_p2 = pnand %p635_p8, %p996_p0  ;;  %s638_s11 = sshll.u32 %s711_s16, 4  ;;  %s639_s11 = int_to_ptr.vmem [resolvable:$false] %s638_s11 }
  0x6f   : > { %s640_s25 = scalar_lea.vmem %s639_s11, 512  ;;  %p641_p7 = scmp.lt.s32.totalorder %s930_s20, %s639_s11 }
  0x70   : > { %p637_p3 = pneg %p636_p2  ;;  %p642_p9 = scmp.lt.s32.totalorder %s640_s25, %s634_s22 }
  0x71   : > { %472 = vmatpush3.bf16.msra.mxu0 %v469_v5 }
  0x72   : > { %474 = vmatprep.subr.bf16.mxu0 %v473_v9  ;;  %p643_p12 = por %p642_p9, %p641_p7 }
  0x74   : > { %p644_p1 = pnand %p643_p12, %p637_p3 }
  0x75   : > { %476 = vmatpush3.bf16.msra.mxu0 %v473_v9 }
  0x78   : > { %463 = vmatmul.mubr.msk.f32.vlgmr.msra.gmra.mrb[0].mxu0 %vm230_vm0, %v223_v10 }
 0x14b   : > { %v464_v13 = vpop.f32.mrb[0].mxu0 }
 0x14c   : > { %v309_v14 = vadd.f32 %v464_v13, %v221_v11  ;;  %v303_v15 = vpop.f32.mrb[1].mxu0 }
 0x14d   : > { %v304_v16 = vadd.f32 %v303_v15, %v220_v12 }
 0x14e   : > { %313 = vst [vmem:[%s217_s18 + $0x8] sm:$0xff] %v309_v14 }
 0x14f   : > { %312 = vst [vmem:[%s217_s18] sm:$0xff] %v304_v16 }
 0x150   : > { %647 = shalt.err (!%p644_p1)
}
 0x151   : > { %s648_s10 = scalar_lea.hbm %s935_s27, 256  ;;  %s652_s26 = scalar_lea.hbm %s982_s3, 512 }
 0x152   : > { %p649_p13 = scmp.ne.s32.totalorder %s935_s27, %s648_s10  ;;  %p653_p4 = scmp.lt.u32.totalorder %s935_s27, %s982_s3 }
 0x153   : > { %p654_p5 = scmp.lt.u32.totalorder %s652_s26, %s648_s10  ;;  %p656_p8 = scmp.lt.u32.totalorder %s648_s10, %s935_s27 }
 0x154   : > { %p650_p6 = pnand %p649_p13, %p996_p0 }
 0x155   : > { %p655_p11 = por %p654_p5, %p653_p4 }
 0x156   : > { %p651_p10 = pneg %p650_p6 }
 0x157   : > { %p657_p2 = por %p656_p8, %p655_p11 }
 0x159   : > { %p658_p3 = pnand %p657_p2, %p651_p10 }
 0x15b   : > { %661 = shalt.err (!%p658_p3)
}
 0x15c   : > { %s712_s5 = smov 128   ;;  %s713_s18 = smov 8  }
 0x15d   : > { %487 = dma.vmem_to_hbm [thread:$0]  (%p996_p0), %s930_s20, 256, %s935_s27, %s315_s28, %s712_s5, %s712_s5, %s713_s18  }
 0x15e PF: > { %s343_s7 = sand.u32 1, %s692_s12   ;;  %p997_p7 = scmp.ne.s32.totalorder %s987_s19, 0 }
 0x15f   : > { %p998_p9 = scmp.ge.s32.totalorder %s704_s15, 2  ;;  %s344_s8 = scalar_lea.sflag [#allocation4], %s343_s7 }
 0x161   : > { %p501_p12 = pnand %p998_p9, %p997_p7 }
 0x163   : > { %687 = dma.done.wait (!%p501_p12), %s344_s8, 256  }
 0x164   : > { %689 = vsyncadd (!%p501_p12), %s344_s8, 4294967040  ;;  %p17_p1 = scmp.ge.s32.totalorder %s850_s23, 4   ;;  %s999_s12 = smov %s696_s13 }
 0x165   : > { %s1000_s13 = smov %s700_s14  ;;  %s1001_s14 = smov %s866_s9 }
 0x166   : > { %s1002_s15 = smov %s850_s23  ;;  %19 = sbr.rel (!%p17_p1) target bundleno = 6 (0x6), region = 85 }
 0x16d   :  { %349 = vsyncpa [#allocation3], 1 }
 0x16e   :  { %351 = vsyncpa [#allocation3 + $0x1], 1 }
 0x16f   :  { %352 = vsyncpa [#allocation6], 1 }
 0x170   :  { %353 = vsyncpa [#allocation4], 1 }
 0x171   :  { %355 = vsyncpa [#allocation4 + $0x1], 1 }

</bundles_post_ra>
